<compile_context>
chip_gen: v5e
topology: v5e:2x2
jax: 0.10.0
libtpu: 0.0.40
codegen_flags: <defaults>
</compile_context>

<pallas_src>
import functools

import jax
import jax.numpy as jnp
from jax.experimental import pallas as pl
from jax.experimental.pallas import tpu as pltpu

HIDDEN = 64   # logical hidden size of the PyTorch module
LANE = 128    # TPU lane width (hidden / fc3 matmul width padded to this)


def _round_up(n, m):
    return ((n + m - 1) // m) * m


def _dqn_kernel(x_ref, w1_ref, b1_ref, w2_ref, b2_ref, w3_ref, b3_ref, o_ref,
                *, out_size):
    # fc1 + ReLU : bf16 MXU matmul with f32 accumulation; bias add + ReLU in f32.
    x = x_ref[...].astype(jnp.bfloat16)          # in-kernel cast (free VPU work)
    h1 = jnp.dot(x, w1_ref[...], preferred_element_type=jnp.float32)
    h1 = jnp.maximum(h1 + b1_ref[...], 0.0)
    # fc2 + ReLU
    h2 = jnp.dot(h1.astype(jnp.bfloat16), w2_ref[...],
                 preferred_element_type=jnp.float32)
    h2 = jnp.maximum(h2 + b2_ref[...], 0.0)
    # fc3 (no activation); matmul over the 128-padded width, slim store of out_size cols.
    out = jnp.dot(h2.astype(jnp.bfloat16), w3_ref[...],
                  preferred_element_type=jnp.float32)
    o_ref[...] = (out + b3_ref[...])[:, :out_size].astype(o_ref.dtype)


def deep_q_network(x, params, *, tile_batch=4096):
    """Forward pass of DeepQNetwork.

    x: (batch, input_size) float32
    params: dict from init_params() (weights bf16, hidden/fc3 width padded to 128)
    returns: (batch, output_size) float32
    """
    out_size = params["out_size"]
    w1, w2, w3 = params["w1"], params["w2"], params["w3"]      # already bf16
    b1, b2, b3 = params["b1"], params["b2"], params["b3"]      # f32

    batch, in_size = x.shape

    # Batch tile selection:
    #  - large batch: tb = tile_batch (big tiles amortize per-step overhead)
    #  - batch fits in one tile: split into 2 tiles when possible so v7x's two
    #    TensorCores both get work (no-op on single-TC v5e/v6e)
    #  - tiny batch: single full-array block.
    if batch <= 16:
        tb = batch
    else:
        tb = min(int(tile_batch), _round_up(batch, 8))
        if tb >= batch:
            tb = _round_up(pl.cdiv(batch, 2), 8)
    grid = (pl.cdiv(batch, tb),)

    pinned = lambda b: (0, 0)   # weights/biases: same block every step -> VMEM-resident

    kernel = functools.partial(_dqn_kernel, out_size=out_size)

    out = pl.pallas_call(
        kernel,
        out_shape=jax.ShapeDtypeStruct((batch, out_size), jnp.float32),
        grid=grid,
        in_specs=[
            pl.BlockSpec((tb, in_size), lambda b: (b, 0)),  # streamed x tile (f32)
            pl.BlockSpec(w1.shape, pinned),
            pl.BlockSpec(b1.shape, pinned),
            pl.BlockSpec(w2.shape, pinned),
            pl.BlockSpec(b2.shape, pinned),
            pl.BlockSpec(w3.shape, pinned),
            pl.BlockSpec(b3.shape, pinned),
        ],
        # Slim output: full logical row width -> contiguous HBM writeback, ragged
        # last tile and OOB rows handled by Pallas partial-block write masking.
        out_specs=pl.BlockSpec((tb, out_size), lambda b: (b, 0)),
        compiler_params=pltpu.CompilerParams(
            dimension_semantics=("parallel",),  # megacore sharding on v7x
        ),
    )(x, w1, b1, w2, b2, w3, b3)

    return out


def init_params(key, input_size, output_size, hidden=HIDDEN):
    """nn.Linear-style uniform(-1/sqrt(fan_in), 1/sqrt(fan_in)) init.

    Hidden dim (64) and fc3 output width are zero-padded to 128 so the in-kernel
    matmuls / h1 / h2 are lane-dense; zero rows/cols are inert through ReLU + matmul.
    Weights are pre-cast to bf16 once here (kernel accumulates in f32); f32 copies are
    kept only for the pure-f32 reference."""
    ks = jax.random.split(key, 6)

    def lin(kw, kb, fan_in, fan_out):
        bound = 1.0 / jnp.sqrt(jnp.float32(fan_in))
        w = jax.random.uniform(kw, (fan_in, fan_out), jnp.float32, -bound, bound)
        b = jax.random.uniform(kb, (1, fan_out), jnp.float32, -bound, bound)
        return w, b

    w1, b1 = lin(ks[0], ks[1], input_size, hidden)
    w2, b2 = lin(ks[2], ks[3], hidden, hidden)
    w3, b3 = lin(ks[4], ks[5], hidden, output_size)

    hid_pad = _round_up(hidden, LANE)
    out_pad = _round_up(output_size, LANE)
    pad2 = lambda a, r, c: jnp.pad(a, ((0, r - a.shape[0]), (0, c - a.shape[1])))

    w1p = pad2(w1, input_size, hid_pad)
    w2p = pad2(w2, hid_pad, hid_pad)
    w3p = pad2(w3, hid_pad, out_pad)

    # TODO(synk): if these params are trained outside this kernel, keep updates off the
    # zero-padded rows/columns so the padding stays inert.
    return {
        "w1": w1p.astype(jnp.bfloat16),
        "b1": pad2(b1, 1, hid_pad),
        "w2": w2p.astype(jnp.bfloat16),
        "b2": pad2(b2, 1, hid_pad),
        "w3": w3p.astype(jnp.bfloat16),
        "b3": pad2(b3, 1, out_pad),
        "w1_f32": w1p, "w2_f32": w2p, "w3_f32": w3p,
        "out_size": output_size,
    }


def reference_forward_f32(x, p):
    """Pure f32 reference (padding columns are zero, so it equals the unpadded model)."""
    h1 = jnp.maximum(x @ p["w1_f32"] + p["b1"], 0.0)
    h2 = jnp.maximum(h1 @ p["w2_f32"] + p["b2"], 0.0)
    return (h2 @ p["w3_f32"] + p["b3"])[:, : p["out_size"]]


def reference_forward_matched(x, p):
    """Reference with the same bf16 casts on the matmul inputs as the kernel."""
    bf = jnp.bfloat16
    h1 = jnp.dot(x.astype(bf), p["w1"], preferred_element_type=jnp.float32) + p["b1"]
    h1 = jnp.maximum(h1, 0.0)
    h2 = jnp.dot(h1.astype(bf), p["w2"], preferred_element_type=jnp.float32) + p["b2"]
    h2 = jnp.maximum(h2, 0.0)
    out = jnp.dot(h2.astype(bf), p["w3"], preferred_element_type=jnp.float32) + p["b3"]
    return out[:, : p["out_size"]]


if __name__ == "__main__":
    key = jax.random.PRNGKey(0)
    k_param, k_x1, k_x2 = jax.random.split(key, 3)

    input_size, output_size = 32, 8
    params = init_params(k_param, input_size, output_size)

    # Small case: single full-array block.
    x_small = jax.random.normal(k_x1, (8, input_size), jnp.float32)
    out_small = jax.block_until_ready(deep_q_network(x_small, params))
    assert out_small.shape == (8, output_size)
    assert jnp.allclose(out_small, reference_forward_matched(x_small, params),
                        atol=2e-3, rtol=2e-3)
    assert jnp.allclose(out_small, reference_forward_f32(x_small, params),
                        atol=5e-2, rtol=5e-2)

    # Larger case: exercises the 2-step batch grid (two TCs on v7x) with a ragged
    # partial last tile (600 = 304 + 296 valid rows).
    x_big = jax.random.normal(k_x2, (600, input_size), jnp.float32)
    out_big = jax.block_until_ready(deep_q_network(x_big, params))
    assert out_big.shape == (600, output_size)
    assert jnp.allclose(out_big, reference_forward_matched(x_big, params),
                        atol=2e-3, rtol=2e-3)
    assert jnp.allclose(out_big, reference_forward_f32(x_big, params),
                        atol=5e-2, rtol=5e-2)

    print("KERNEL_OK")
</pallas_src>

<mosaic_0001>
module attributes {stable_mosaic.version = 11 : i64} {
  func.func @_dqn_kernel(%arg0: i32, %arg1: memref<8x32xf32, #tpu.memory_space<vmem>>, %arg2: memref<32x128xbf16, #tpu.memory_space<vmem>>, %arg3: memref<1x128xf32, #tpu.memory_space<vmem>>, %arg4: memref<128x128xbf16, #tpu.memory_space<vmem>>, %arg5: memref<1x128xf32, #tpu.memory_space<vmem>>, %arg6: memref<128x128xbf16, #tpu.memory_space<vmem>>, %arg7: memref<1x128xf32, #tpu.memory_space<vmem>>, %arg8: memref<8x8xf32, #tpu.memory_space<vmem>>) attributes {dimension_semantics = [#tpu.dimension_semantics<parallel>], iteration_bounds = array<i64: 1>, scalar_prefetch = 0 : i64, scratch_operands = 0 : i64, tpu.core_type = #tpu.core_type<tc>, window_params = [{transform_indices = @transform_0, window_bounds = array<i64: 8, 32>}, {pipeline_mode = #tpu.pipeline_mode<synchronous>, transform_indices = @transform_1, window_bounds = array<i64: 32, 128>}, {pipeline_mode = #tpu.pipeline_mode<synchronous>, transform_indices = @transform_2, window_bounds = array<i64: 1, 128>}, {pipeline_mode = #tpu.pipeline_mode<synchronous>, transform_indices = @transform_3, window_bounds = array<i64: 128, 128>}, {pipeline_mode = #tpu.pipeline_mode<synchronous>, transform_indices = @transform_4, window_bounds = array<i64: 1, 128>}, {pipeline_mode = #tpu.pipeline_mode<synchronous>, transform_indices = @transform_5, window_bounds = array<i64: 128, 128>}, {pipeline_mode = #tpu.pipeline_mode<synchronous>, transform_indices = @transform_6, window_bounds = array<i64: 1, 128>}, {transform_indices = @transform_7, window_bounds = array<i64: 8, 8>}]} {
    %c0 = arith.constant 0 : index
    %c0_0 = arith.constant 0 : index
    %0 = vector.load %arg1[%c0, %c0_0] : memref<8x32xf32, #tpu.memory_space<vmem>>, vector<8x32xf32>
    %1 = arith.truncf %0 : vector<8x32xf32> to vector<8x32xbf16>
    %c0_1 = arith.constant 0 : index
    %c0_2 = arith.constant 0 : index
    %2 = vector.load %arg2[%c0_1, %c0_2] : memref<32x128xbf16, #tpu.memory_space<vmem>>, vector<32x128xbf16>
    %cst = arith.constant dense<0.000000e+00> : vector<8x128xf32>
    %3 = tpu.matmul %1, %2, %cst {dimension_numbers = #tpu.dot_dimension_numbers<[1], [0], [0], [1], [0, 0, 1, 1], [], []>} : vector<8x32xbf16>, vector<32x128xbf16>, vector<8x128xf32> -> vector<8x128xf32>
    %c0_3 = arith.constant 0 : index
    %c0_4 = arith.constant 0 : index
    %4 = vector.load %arg3[%c0_3, %c0_4] : memref<1x128xf32, #tpu.memory_space<vmem>>, vector<1x128xf32>
    %5 = vector.broadcast %4 : vector<1x128xf32> to vector<8x128xf32>
    %6 = arith.addf %3, %5 : vector<8x128xf32>
    %cst_5 = arith.constant 0.000000e+00 : f32
    %7 = vector.broadcast %cst_5 : f32 to vector<8x128xf32>
    %8 = arith.maximumf %6, %7 : vector<8x128xf32>
    %9 = arith.truncf %8 : vector<8x128xf32> to vector<8x128xbf16>
    %c0_6 = arith.constant 0 : index
    %c0_7 = arith.constant 0 : index
    %10 = vector.load %arg4[%c0_6, %c0_7] : memref<128x128xbf16, #tpu.memory_space<vmem>>, vector<128x128xbf16>
    %cst_8 = arith.constant dense<0.000000e+00> : vector<8x128xf32>
    %11 = tpu.matmul %9, %10, %cst_8 {dimension_numbers = #tpu.dot_dimension_numbers<[1], [0], [0], [1], [0, 0, 1, 1], [], []>} : vector<8x128xbf16>, vector<128x128xbf16>, vector<8x128xf32> -> vector<8x128xf32>
    %c0_9 = arith.constant 0 : index
    %c0_10 = arith.constant 0 : index
    %12 = vector.load %arg5[%c0_9, %c0_10] : memref<1x128xf32, #tpu.memory_space<vmem>>, vector<1x128xf32>
    %13 = vector.broadcast %12 : vector<1x128xf32> to vector<8x128xf32>
    %14 = arith.addf %11, %13 : vector<8x128xf32>
    %cst_11 = arith.constant 0.000000e+00 : f32
    %15 = vector.broadcast %cst_11 : f32 to vector<8x128xf32>
    %16 = arith.maximumf %14, %15 : vector<8x128xf32>
    %17 = arith.truncf %16 : vector<8x128xf32> to vector<8x128xbf16>
    %c0_12 = arith.constant 0 : index
    %c0_13 = arith.constant 0 : index
    %18 = vector.load %arg6[%c0_12, %c0_13] : memref<128x128xbf16, #tpu.memory_space<vmem>>, vector<128x128xbf16>
    %cst_14 = arith.constant dense<0.000000e+00> : vector<8x128xf32>
    %19 = tpu.matmul %17, %18, %cst_14 {dimension_numbers = #tpu.dot_dimension_numbers<[1], [0], [0], [1], [0, 0, 1, 1], [], []>} : vector<8x128xbf16>, vector<128x128xbf16>, vector<8x128xf32> -> vector<8x128xf32>
    %c0_15 = arith.constant 0 : index
    %c0_16 = arith.constant 0 : index
    %20 = vector.load %arg7[%c0_15, %c0_16] : memref<1x128xf32, #tpu.memory_space<vmem>>, vector<1x128xf32>
    %21 = vector.broadcast %20 : vector<1x128xf32> to vector<8x128xf32>
    %22 = arith.addf %19, %21 : vector<8x128xf32>
    %23 = vector.extract_strided_slice %22 {offsets = [0, 0], sizes = [8, 8], strides = [1, 1]} : vector<8x128xf32> to vector<8x8xf32>
    %c0_17 = arith.constant 0 : index
    %c0_18 = arith.constant 0 : index
    %24 = vector.load %arg8[%c0_17, %c0_18] : memref<8x8xf32, #tpu.memory_space<vmem>>, vector<8x8xf32>
    tpu.vector_store %arg8[%c0_17, %c0_18], %23 {strides = array<i32>} : memref<8x8xf32, #tpu.memory_space<vmem>>, vector<8x8xf32>,
    return
  }
  func.func @transform_0(%arg0: i32) -> (i32, i32) {
    %c0_i32 = arith.constant 0 : i32
    %c0_i32_0 = arith.constant 0 : i32
    return %arg0, %c0_i32 : i32, i32
  }
  func.func @transform_1(%arg0: i32) -> (i32, i32) {
    %c0_i32 = arith.constant 0 : i32
    %c0_i32_0 = arith.constant 0 : i32
    %c0_i32_1 = arith.constant 0 : i32
    return %c0_i32, %c0_i32_0 : i32, i32
  }
  func.func @transform_2(%arg0: i32) -> (i32, i32) {
    %c0_i32 = arith.constant 0 : i32
    %c0_i32_0 = arith.constant 0 : i32
    %c0_i32_1 = arith.constant 0 : i32
    return %c0_i32, %c0_i32_0 : i32, i32
  }
  func.func @transform_3(%arg0: i32) -> (i32, i32) {
    %c0_i32 = arith.constant 0 : i32
    %c0_i32_0 = arith.constant 0 : i32
    %c0_i32_1 = arith.constant 0 : i32
    return %c0_i32, %c0_i32_0 : i32, i32
  }
  func.func @transform_4(%arg0: i32) -> (i32, i32) {
    %c0_i32 = arith.constant 0 : i32
    %c0_i32_0 = arith.constant 0 : i32
    %c0_i32_1 = arith.constant 0 : i32
    return %c0_i32, %c0_i32_0 : i32, i32
  }
  func.func @transform_5(%arg0: i32) -> (i32, i32) {
    %c0_i32 = arith.constant 0 : i32
    %c0_i32_0 = arith.constant 0 : i32
    %c0_i32_1 = arith.constant 0 : i32
    return %c0_i32, %c0_i32_0 : i32, i32
  }
  func.func @transform_6(%arg0: i32) -> (i32, i32) {
    %c0_i32 = arith.constant 0 : i32
    %c0_i32_0 = arith.constant 0 : i32
    %c0_i32_1 = arith.constant 0 : i32
    return %c0_i32, %c0_i32_0 : i32, i32
  }
  func.func @transform_7(%arg0: i32) -> (i32, i32) {
    %c0_i32 = arith.constant 0 : i32
    %c0_i32_0 = arith.constant 0 : i32
    return %arg0, %c0_i32 : i32, i32
  }
}

</mosaic_0001>

<bundles_post_ra>
// kernel: tpu_custom_call.1
= control target key start
LH: loop header
LB: loop body
LE: loop exit
PB: predicated region body
PF: predicated region fallthrough
CT: control target
= control target key end

     0   :  { %12 = vsyncpa [#allocation3], 0  ;;  %s615_s0 = inlined_call_operand.hbm [shape: f32[8,32], index: 0, kind: input, shape index: {}]   ;;  %s616_s1 = inlined_call_operand.hbm [shape: bf16[32,128], index: 1, kind: input, shape index: {}]   ;;  %s617_s2 = inlined_call_operand.vmem [shape: f32[1,128], index: 2, kind: input, shape index: {}]   ;;  %s618_s3 = inlined_call_operand.hbm [shape: bf16[128,128], index: 3, kind: input, shape index: {}]   ;;  %s619_s4 = inlined_call_operand.vmem [shape: f32[1,128], index: 4, kind: input, shape index: {}]   ;;  %s620_s5 = inlined_call_operand.hbm [shape: bf16[128,128], index: 5, kind: input, shape index: {}]   ;;  %s621_s6 = inlined_call_operand.vmem [shape: f32[1,128], index: 6, kind: input, shape index: {}]   ;;  %s622_s7 = inlined_call_operand.hbm [shape: f32[8,8], index: 7, kind: output, shape index: {}]  }
   0x1   :  { %13 = vsyncpa [#allocation6], 0 }
   0x2   :  { %14 = vsyncpa [#allocation9], 0  ;;  %s31_s26 = sshll.u32 %s616_s1, 4  ;;  %s32_s26 = int_to_ptr.hbm [resolvable:$true] %s31_s26 }
   0x3   :  { %15 = vsyncpa [#allocation4], 0  ;;  %s544_s27 = smov [#allocation5]   ;;  %s21_s8 = sshll.u32 %s615_s0, 4  ;;  %s22_s8 = int_to_ptr.hbm [resolvable:$true] %s21_s8 }
   0x4   :  { %s33_s28 = sshll.u32 %s544_s27, 4  ;;  %s545_s9 = smov 64   ;;  %s34_s28 = int_to_ptr.vmem [resolvable:$true] %s33_s28 }
   0x5   :  { %s546_s10 = smov 4   ;;  %s547_s11 = smov [#allocation2]  }
   0x6   :  { %39 = dma.hbm_to_vmem [thread:$0]  %s32_s26, 256, %s34_s28, [#allocation6], %s545_s9, %s545_s9, %s546_s10  }
   0x7   :  { %s23_s12 = sshll.u32 %s547_s11, 4  ;;  %s46_s15 = sshll.u32 %s618_s3, 4  ;;  %s24_s12 = int_to_ptr.vmem [resolvable:$true] %s23_s12  ;;  %s47_s15 = int_to_ptr.hbm [resolvable:$true] %s46_s15 }
   0x8   :  { %26 = dma.hbm_to_vmem [thread:$0]  %s22_s8, 128, %s24_s12, [#allocation3]  }
   0x9   :  { %s61_s17 = sshll.u32 %s620_s5, 4  ;;  %s548_s18 = smov [#allocation7]   ;;  %s62_s17 = int_to_ptr.hbm [resolvable:$true] %s61_s17 }
   0xa   :  { %s48_s19 = sshll.u32 %s548_s18, 4  ;;  %s549_s0 = smov [#allocation8]   ;;  %s49_s19 = int_to_ptr.vmem [resolvable:$true] %s48_s19 }
   0xb   :  { %54 = dma.hbm_to_vmem [thread:$0]  %s47_s15, 1024, %s49_s19, [#allocation6], %s545_s9, %s545_s9, %s546_s10  }
   0xc   :  { %s63_s20 = sshll.u32 %s549_s0, 4  ;;  %s64_s20 = int_to_ptr.vmem [resolvable:$true] %s63_s20 }
   0xd   :  { %69 = dma.hbm_to_vmem [thread:$0]  %s62_s17, 1024, %s64_s20, [#allocation9], %s545_s9, %s545_s9, %s546_s10  }
   0xe   :  { %536 = dma.done.wait [#allocation3], 128  }
   0xf   :  { %537 = vsyncadd [#allocation3], 4294967168 }
  0x10   :  { %538 = dma.done.wait [#allocation6], 1280  }
  0x11   :  { %539 = vsyncadd [#allocation6], 4294966016 }
  0x12   :  { %540 = dma.done.wait [#allocation9], 1024  }
  0x13   :  { %541 = vsyncadd [#allocation9], 4294966272  ;;  %v389_v0 = vld [vmem:[#allocation5 + $0x8] sm:$0xff]  ;;  %v388_v2 = vld [vmem:[#allocation5] sm:$0xff]  ;;  %vm111_vm0 = vcmask 261120   ;;  %s550_s24 = smov [#allocation10]  }
  0x14   :  { %v397_v1 = vld [vmem:[#allocation7 + $0x38] sm:$0xff]  ;;  %121 = vmatpush.bf16.msra.mxu0 %v389_v0  ;;  %v89_v3 = vld [vmem:[#allocation2] sm:$0xff]  ;;  %v396_v4 = vld [vmem:[#allocation7 + $0x30] sm:$0xff]  ;;  %s301_s25 = sshll.u32 %s550_s24, 4  ;;  %s303_s28 = sshll.u32 %s622_s7, 4  ;;  %vm294_vm1 = vcmask 64512   ;;  %s302_s25 = int_to_ptr.vmem [resolvable:$true] %s301_s25  ;;  %s304_s28 = int_to_ptr.hbm [resolvable:$true] %s303_s28 }
  0x15   :  { %198 = vmatpush.bf16.msra.mxu1 %v397_v1  ;;  %v90_v5 = vpack.c.bf16 %v89_v3, %v89_v3  ;;  %v395_v6 = vld [vmem:[#allocation7 + $0x28] sm:$0xff]  ;;  %v394_v7 = vld [vmem:[#allocation7 + $0x20] sm:$0xff]  ;;  %v393_v8 = vld [vmem:[#allocation7 + $0x18] sm:$0xff] }
  0x16   :  { %v392_v9 = vld [vmem:[#allocation7 + $0x10] sm:$0xff]  ;;  %v391_v10 = vld [vmem:[#allocation7 + $0x8] sm:$0xff]  ;;  %v390_v11 = vld [vmem:[#allocation7] sm:$0xff] }
  0x17   :  { %v405_v12 = vld [vmem:[#allocation8 + $0x38] sm:$0xff]  ;;  %v404_v13 = vld [vmem:[#allocation8 + $0x30] sm:$0xff]  ;;  %v403_v14 = vld [vmem:[#allocation8 + $0x28] sm:$0xff] }
  0x18   :  { %122 = vmatpush.bf16.msra.mxu0 %v388_v2  ;;  %281 = vmatpush.bf16.msra.mxu2 %v405_v12  ;;  %v402_v15 = vld [vmem:[#allocation8 + $0x20] sm:$0xff]  ;;  %v401_v16 = vld [vmem:[#allocation8 + $0x18] sm:$0xff]  ;;  %v400_v17 = vld [vmem:[#allocation8 + $0x10] sm:$0xff] }
  0x19   :  { %199 = vmatpush.bf16.msra.mxu1 %v396_v4  ;;  %v413_v18 = vld [vmem:[%s617_s2] ss:$0 sm:$0xff]  ;;  %v398_v25 = vld [vmem:[#allocation8] sm:$0xff] }
  0x1a   :  { %v399_v24 = vld [vmem:[#allocation8 + $0x8] sm:$0xff] }
  0x1b   :  { %323 = vmatmul.msk.bf16.vlgmr.msra.gmra.mxu0 %vm111_vm0, %v90_v5  ;;  %v414_v26 = vld [vmem:[%s619_s4] ss:$0 sm:$0xff] }
  0x1c   :  { %282 = vmatpush.bf16.msra.mxu2 %v404_v13  ;;  %v415_v32 = vld [vmem:[%s621_s6] ss:$0 sm:$0xff] }
  0x1d   :  { %200 = vmatpush.bf16.msra.mxu1 %v395_v6 }
  0x20   :  { %283 = vmatpush.bf16.msra.mxu2 %v403_v14 }
  0x21   :  { %201 = vmatpush.bf16.msra.mxu1 %v394_v7 }
  0x24   :  { %284 = vmatpush.bf16.msra.mxu2 %v402_v15 }
  0x25   :  { %202 = vmatpush.bf16.msra.mxu1 %v393_v8 }
  0x28   :  { %285 = vmatpush.bf16.msra.mxu2 %v401_v16 }
  0x29   :  { %203 = vmatpush.bf16.msra.mxu1 %v392_v9 }
  0x2c   :  { %286 = vmatpush.bf16.msra.mxu2 %v400_v17 }
  0x2d   :  { %204 = vmatpush.bf16.msra.mxu1 %v391_v10 }
  0x30   :  { %287 = vmatpush.bf16.msra.mxu2 %v399_v24 }
  0x31   :  { %205 = vmatpush.bf16.msra.mxu1 %v390_v11 }
  0x34   :  { %288 = vmatpush.bf16.msra.mxu2 %v398_v25 }
  0x98   :  { %v124_v19 = vpop.f32.mrf.mxu0 }
  0x99   :  { %v125_v20 = vadd.f32 %v413_v18, %v124_v19 }
  0x9b   :  { %v128_v21 = vmax.f32 %v125_v20, 0.0 }
  0x9d   :  { %v129_v22 = vpack.c.bf16 %v128_v21, %v128_v21 }
  0x9f   :  { %206 = vmatmul.bf16.vlgmr.msra.gmra.mxu1 %v129_v22 }
  0xa0   :  { %v126_v23 = vpop.f32.mrf.mxu0 }
 0x11c   :  { %v207_v27 = vpop.f32.mrf.mxu1 }
 0x11d   :  { %v208_v28 = vadd.f32 %v414_v26, %v207_v27 }
 0x11f   :  { %v211_v29 = vmax.f32 %v208_v28, 0.0 }
 0x121   :  { %v212_v30 = vpack.c.bf16 %v211_v29, %v211_v29 }
 0x123   :  { %289 = vmatmul.bf16.vlgmr.msra.gmra.mxu2 %v212_v30 }
 0x124   :  { %v209_v31 = vpop.f32.mrf.mxu1 }
 0x1a6   :  { %v290_v33 = vpop.f32.mrf.mxu2 }
 0x1a7   :  { %v291_v34 = vadd.f32 %v415_v32, %v290_v33 }
 0x1a9   :  { %295 = vst.msk [vmem:[#allocation10] sm:$0xff] %vm294_vm1, %v291_v34 }
 0x1aa   :  { %306 = dma.vmem_to_hbm [thread:$0]  %s302_s25, 128, %s304_s28, [#allocation4]  }
 0x1ae   :  { %v292_v35 = vpop.f32.mrf.mxu2 }
 0x1af   :  { %542 = dma.done.wait [#allocation4], 128  }
 0x1b0   :  { %543 = vsyncadd [#allocation4], 4294967168 }
 0x1b1   :  { %311 = vsyncpa [#allocation3], 1 }
 0x1b2   :  { %312 = vsyncpa [#allocation6], 1 }
 0x1b3   :  { %313 = vsyncpa [#allocation9], 1 }
 0x1b4   :  { %314 = vsyncpa [#allocation4], 1 }

</bundles_post_ra>
